<compile_context>
chip_gen: v5e
topology: v5e:2x2
jax: 0.10.0
libtpu: 0.0.40
codegen_flags: <defaults>
</compile_context>

<pallas_src>
import jax
import jax.numpy as jnp
from jax.experimental import pallas as pl
from jax.experimental.pallas import tpu as pltpu


def _round_up(x, m):
    return ((x + m - 1) // m) * m


def _ce_loss_kernel(logits_ref, targets_ref, weights_ref, loss_ref,
                    num_acc, den_acc):
    i = pl.program_id(0)

    @pl.when(i == 0)
    def _init():
        num_acc[...] = jnp.zeros_like(num_acc)
        den_acc[...] = jnp.zeros_like(den_acc)

    x = logits_ref[...].astype(jnp.float32)    # (tn, C), upcast in-kernel
    tgt = targets_ref[...]                      # (tn, 1) int32
    w = weights_ref[...]                        # (1, C)  float32

    # Numerically stable logsumexp over the class (lane) axis.
    m = jnp.max(x, axis=-1, keepdims=True)                                 # (tn, 1)
    lse = m + jnp.log(jnp.sum(jnp.exp(x - m), axis=-1, keepdims=True))     # (tn, 1)

    # Fused one-hot select: wsel[r, c] = w[c] iff c == t_r else 0.
    # Ignored / padding rows (t_r == -1) match no column -> zero contribution.
    col = jax.lax.broadcasted_iota(jnp.int32, x.shape, 1)                  # (tn, C)
    wsel = jnp.where(col == tgt, w, 0.0)                                   # (tn, C)

    # Per-row target weight and weighted target logit (lane-only reductions).
    w_t = jnp.sum(wsel, axis=-1, keepdims=True)                            # (tn, 1)
    xw = jnp.sum(wsel * x, axis=-1, keepdims=True)                         # (tn, 1)

    # Per-row vector partials; the cross-row collapse happens once at the end.
    num_acc[...] += w_t * lse - xw
    den_acc[...] += w_t

    @pl.when(i == pl.num_programs(0) - 1)
    def _finalize():
        # Weighted mean (NaN when every target is ignored, matching PyTorch).
        loss_ref[0, 0] = jnp.sum(num_acc[...]) / jnp.sum(den_acc[...])


def _vmem_capacity_bytes():
    try:
        return int(pltpu.get_tpu_info().vmem_capacity_bytes)
    except Exception:
        return 64 << 20  # conservative: v7x per-TensorCore VMEM


def _pick_tile_rows(c, itemsize):
    """Largest row-tile that fits the per-generation VMEM budget."""
    # Rows per native sublane tile: f32 -> 8, bf16 -> 16, int8/fp8 -> 32.
    pack = 8 * max(1, 4 // max(1, itemsize))
    c_pad = _round_up(c, 128)  # lane dim is padded to 128 in VMEM
    row_bytes = (
        2 * c_pad * itemsize   # double-buffered logits window
        + 2 * 128 * 4          # double-buffered (tn, 1) int32 targets (lane padded)
        + 6 * c_pad * 4        # live (tn, C) f32 temporaries (x, exp, iota, wsel, products)
        + 6 * 128 * 4          # (tn, 1) f32 temporaries + the two VMEM accumulators
    )
    physical = _vmem_capacity_bytes()
    budget = min((physical * 3) // 4, physical - (16 << 20))
    budget = max(budget, 16 << 20)
    tn_cap = max(pack, (budget // row_bytes) // pack * pack)
    return tn_cap, int(budget), pack


def multi_route_loss(predictions, targets, class_weights=None, tile_n=None,
                     min_kernel_rows=0):
    """predictions: (N, C) float (any dtype), targets: (N,) int (-1 == ignore).

    tile_n=None -> auto-size the row tile from the VMEM budget.
    min_kernel_rows -> below this N, use the fused pure-JAX path instead of
    launching the kernel (disabled by default)."""
    n, c = predictions.shape
    if class_weights is None:
        class_weights = jnp.ones((c,), dtype=jnp.float32)
    class_weights = class_weights.astype(jnp.float32)

    if n < min_kernel_rows:
        return _reference_loss(predictions, targets, class_weights)

    itemsize = jnp.dtype(predictions.dtype).itemsize
    tn_cap, vmem_budget, pack = _pick_tile_rows(c, itemsize)
    if tile_n is not None:
        tn_cap = min(tn_cap, _round_up(int(tile_n), pack))
    tn = min(tn_cap, _round_up(n, pack))

    # Keep logits in their native dtype (no host-side f32 upcast).
    logits = predictions
    tgt2d = targets.astype(jnp.int32).reshape(n, 1)
    w2d = class_weights.reshape(1, c)

    # Pad N to a tile multiple with target=-1 rows (zero contribution).
    n_pad = _round_up(n, tn)
    if n_pad != n:
        logits = jnp.pad(logits, ((0, n_pad - n), (0, 0)))
        tgt2d = jnp.pad(tgt2d, ((0, n_pad - n), (0, 0)), constant_values=-1)
    grid = (n_pad // tn,)

    out = pl.pallas_call(
        _ce_loss_kernel,
        out_shape=jax.ShapeDtypeStruct((1, 1), jnp.float32),
        grid=grid,
        in_specs=[
            pl.BlockSpec((tn, c), lambda i: (i, 0)),   # logits tile
            pl.BlockSpec((tn, 1), lambda i: (i, 0)),   # targets tile
            pl.BlockSpec((1, c), lambda i: (0, 0)),    # class weights (resident)
        ],
        out_specs=pl.BlockSpec(memory_space=pltpu.MemorySpace.SMEM),
        scratch_shapes=[
            pltpu.VMEM((tn, 1), jnp.float32),   # per-row weighted-NLL partials
            pltpu.VMEM((tn, 1), jnp.float32),   # per-row weight partials
        ],
        compiler_params=pltpu.CompilerParams(
            dimension_semantics=("arbitrary",),   # cross-tile reduction axis
            vmem_limit_bytes=int(vmem_budget),
        ),
    )(logits, tgt2d, w2d)
    return out[0, 0]


def _reference_loss(predictions, targets, class_weights):
    # Pure-JAX reference of weighted CE with ignore_index=-1 (mean reduction).
    logits = predictions.astype(jnp.float32)
    lse = jax.nn.logsumexp(logits, axis=-1)
    safe_t = jnp.where(targets == -1, 0, targets)
    tl = jnp.take_along_axis(logits, safe_t[:, None], axis=-1)[:, 0]
    sw = class_weights[safe_t]
    valid = (targets != -1).astype(jnp.float32)
    num = jnp.sum(valid * sw * (lse - tl))
    den = jnp.sum(valid * sw)
    return num / den


if __name__ == "__main__":
    key = jax.random.PRNGKey(0)
    k_pred, k_tgt, k_pred2, k_tgt2 = jax.random.split(key, 4)

    # Small config matching the module: batch of 8 plays, 16 route classes.
    N, C = 8, 16
    predictions = jax.random.normal(k_pred, (N, C), dtype=jnp.float32)
    targets = jax.random.randint(k_tgt, (N,), 0, C, dtype=jnp.int32)
    targets = targets.at[3].set(-1)  # one ignored sample

    # Deterministic, in-script class weights (no checkpoint loading).
    class_weights = 0.5 + jnp.arange(C, dtype=jnp.float32) / C

    loss = jax.block_until_ready(multi_route_loss(predictions, targets, class_weights))
    ref = _reference_loss(predictions, targets, class_weights)
    assert jnp.allclose(loss, ref, rtol=1e-5, atol=1e-5), (loss, ref)

    # Larger multi-tile bf16 case: exercises padding, cross-tile VMEM accumulation,
    # and the native-dtype (no host upcast) DMA path. tile_n forces 3 grid steps.
    N2 = 300
    preds2 = jax.random.normal(k_pred2, (N2, C), dtype=jnp.float32).astype(jnp.bfloat16)
    tgts2 = jax.random.randint(k_tgt2, (N2,), 0, C, dtype=jnp.int32)
    tgts2 = tgts2.at[::7].set(-1)  # a sprinkling of ignored samples
    loss2 = jax.block_until_ready(
        multi_route_loss(preds2, tgts2, class_weights, tile_n=128))
    ref2 = _reference_loss(preds2, tgts2, class_weights)
    assert jnp.allclose(loss2, ref2, rtol=1e-4, atol=1e-4), (loss2, ref2)

    print("KERNEL_OK")
</pallas_src>

<mosaic_0001>
module attributes {stable_mosaic.version = 11 : i64} {
  func.func @_ce_loss_kernel(%arg0: i32, %arg1: memref<8x16xf32, #tpu.memory_space<vmem>>, %arg2: memref<8x1xi32, #tpu.memory_space<vmem>>, %arg3: memref<1x16xf32, #tpu.memory_space<vmem>>, %arg4: memref<1x1xf32, #tpu.memory_space<smem>>, %arg5: memref<8x1xf32, #tpu.memory_space<vmem>>, %arg6: memref<8x1xf32, #tpu.memory_space<vmem>>) attributes {dimension_semantics = [#tpu.dimension_semantics<arbitrary>], iteration_bounds = array<i64: 1>, scalar_prefetch = 0 : i64, scratch_operands = 2 : i64, tpu.core_type = #tpu.core_type<tc>, window_params = [{transform_indices = @transform_0, window_bounds = array<i64: 8, 16>}, {transform_indices = @transform_1, window_bounds = array<i64: 8, 1>}, {pipeline_mode = #tpu.pipeline_mode<synchronous>, transform_indices = @transform_2, window_bounds = array<i64: 1, 16>}, {transform_indices = @transform_3, window_bounds = array<i64: 1, 1>}]} {
    %c0_i32 = arith.constant 0 : i32
    %0 = arith.cmpi eq, %arg0, %c0_i32 : i32
    %1 = arith.extui %0 : i1 to i32
    %c0_i32_0 = arith.constant 0 : i32
    %2 = arith.cmpi ne, %1, %c0_i32_0 : i32
    scf.if %2 {
      %cst_20 = arith.constant 0.000000e+00 : f32
      %38 = vector.broadcast %cst_20 : f32 to vector<8x1xf32>
      %c0_21 = arith.constant 0 : index
      %c0_22 = arith.constant 0 : index
      %39 = vector.load %arg5[%c0_21, %c0_22] : memref<8x1xf32, #tpu.memory_space<vmem>>, vector<8x1xf32>
      tpu.vector_store %arg5[%c0_21, %c0_22], %38 {strides = array<i32>} : memref<8x1xf32, #tpu.memory_space<vmem>>, vector<8x1xf32>,
      %cst_23 = arith.constant 0.000000e+00 : f32
      %40 = vector.broadcast %cst_23 : f32 to vector<8x1xf32>
      %c0_24 = arith.constant 0 : index
      %c0_25 = arith.constant 0 : index
      %41 = vector.load %arg6[%c0_24, %c0_25] : memref<8x1xf32, #tpu.memory_space<vmem>>, vector<8x1xf32>
      tpu.vector_store %arg6[%c0_24, %c0_25], %40 {strides = array<i32>} : memref<8x1xf32, #tpu.memory_space<vmem>>, vector<8x1xf32>,
    } else {
    }
    %c0 = arith.constant 0 : index
    %c0_1 = arith.constant 0 : index
    %3 = vector.load %arg1[%c0, %c0_1] : memref<8x16xf32, #tpu.memory_space<vmem>>, vector<8x16xf32>
    %c0_2 = arith.constant 0 : index
    %c0_3 = arith.constant 0 : index
    %4 = vector.load %arg2[%c0_2, %c0_3] : memref<8x1xi32, #tpu.memory_space<vmem>>, vector<8x1xi32>
    %c0_4 = arith.constant 0 : index
    %c0_5 = arith.constant 0 : index
    %5 = vector.load %arg3[%c0_4, %c0_5] : memref<1x16xf32, #tpu.memory_space<vmem>>, vector<1x16xf32>
    %cst = arith.constant dense<0xFF800000> : vector<8xf32>
    %6 = vector.multi_reduction <maximumf>, %3, %cst [1] : vector<8x16xf32> to vector<8xf32>
    %7 = vector.shape_cast %6 : vector<8xf32> to vector<8x1xf32>
    %8 = vector.broadcast %7 : vector<8x1xf32> to vector<8x16xf32>
    %9 = arith.subf %3, %8 : vector<8x16xf32>
    %10 = math.exp %9 : vector<8x16xf32>
    %cst_6 = arith.constant dense<0.000000e+00> : vector<8xf32>
    %11 = vector.multi_reduction <add>, %10, %cst_6 [1] : vector<8x16xf32> to vector<8xf32>
    %12 = vector.shape_cast %11 : vector<8xf32> to vector<8x1xf32>
    %13 = math.log %12 : vector<8x1xf32>
    %14 = arith.addf %7, %13 : vector<8x1xf32>
    %15 = tpu.iota {dimensions = array<i32: 1>} : vector<8x16xi32>
    %16 = vector.broadcast %4 : vector<8x1xi32> to vector<8x16xi32>
    %17 = arith.cmpi eq, %15, %16 : vector<8x16xi32>
    %cst_7 = arith.constant 0.000000e+00 : f32
    %18 = vector.shape_cast %5 : vector<1x16xf32> to vector<1x16xf32>
    %19 = vector.broadcast %18 : vector<1x16xf32> to vector<8x16xf32>
    %20 = vector.broadcast %cst_7 : f32 to vector<8x16xf32>
    %21 = arith.select %17, %19, %20 : vector<8x16xi1>, vector<8x16xf32>
    %cst_8 = arith.constant dense<0.000000e+00> : vector<8xf32>
    %22 = vector.multi_reduction <add>, %21, %cst_8 [1] : vector<8x16xf32> to vector<8xf32>
    %23 = vector.shape_cast %22 : vector<8xf32> to vector<8x1xf32>
    %24 = arith.mulf %21, %3 : vector<8x16xf32>
    %cst_9 = arith.constant dense<0.000000e+00> : vector<8xf32>
    %25 = vector.multi_reduction <add>, %24, %cst_9 [1] : vector<8x16xf32> to vector<8xf32>
    %26 = vector.shape_cast %25 : vector<8xf32> to vector<8x1xf32>
    %c0_10 = arith.constant 0 : index
    %c0_11 = arith.constant 0 : index
    %27 = vector.load %arg5[%c0_10, %c0_11] : memref<8x1xf32, #tpu.memory_space<vmem>>, vector<8x1xf32>
    %28 = arith.mulf %23, %14 : vector<8x1xf32>
    %29 = arith.subf %28, %26 : vector<8x1xf32>
    %30 = arith.addf %27, %29 : vector<8x1xf32>
    %c0_12 = arith.constant 0 : index
    %c0_13 = arith.constant 0 : index
    %31 = vector.load %arg5[%c0_12, %c0_13] : memref<8x1xf32, #tpu.memory_space<vmem>>, vector<8x1xf32>
    tpu.vector_store %arg5[%c0_12, %c0_13], %30 {strides = array<i32>} : memref<8x1xf32, #tpu.memory_space<vmem>>, vector<8x1xf32>,
    %c0_14 = arith.constant 0 : index
    %c0_15 = arith.constant 0 : index
    %32 = vector.load %arg6[%c0_14, %c0_15] : memref<8x1xf32, #tpu.memory_space<vmem>>, vector<8x1xf32>
    %33 = arith.addf %32, %23 : vector<8x1xf32>
    %c0_16 = arith.constant 0 : index
    %c0_17 = arith.constant 0 : index
    %34 = vector.load %arg6[%c0_16, %c0_17] : memref<8x1xf32, #tpu.memory_space<vmem>>, vector<8x1xf32>
    tpu.vector_store %arg6[%c0_16, %c0_17], %33 {strides = array<i32>} : memref<8x1xf32, #tpu.memory_space<vmem>>, vector<8x1xf32>,
    %c0_i32_18 = arith.constant 0 : i32
    %35 = arith.cmpi eq, %arg0, %c0_i32_18 : i32
    %36 = arith.extui %35 : i1 to i32
    %c0_i32_19 = arith.constant 0 : i32
    %37 = arith.cmpi ne, %36, %c0_i32_19 : i32
    scf.if %37 {
      %c0_20 = arith.constant 0 : index
      %c0_21 = arith.constant 0 : index
      %38 = vector.load %arg5[%c0_20, %c0_21] : memref<8x1xf32, #tpu.memory_space<vmem>>, vector<8x1xf32>
      %39 = vector.shape_cast %38 : vector<8x1xf32> to vector<1x8x1xf32>
      %cst_22 = arith.constant dense<0.000000e+00> : vector<1xf32>
      %40 = vector.multi_reduction <add>, %39, %cst_22 [1, 2] : vector<1x8x1xf32> to vector<1xf32>
      %41 = vector.shape_cast %40 : vector<1xf32> to vector<1x1x1xf32>
      %42 = vector.extract %41[0, 0, 0] : f32 from vector<1x1x1xf32>
      %c0_23 = arith.constant 0 : index
      %c0_24 = arith.constant 0 : index
      %43 = vector.load %arg6[%c0_23, %c0_24] : memref<8x1xf32, #tpu.memory_space<vmem>>, vector<8x1xf32>
      %44 = vector.shape_cast %43 : vector<8x1xf32> to vector<1x8x1xf32>
      %cst_25 = arith.constant dense<0.000000e+00> : vector<1xf32>
      %45 = vector.multi_reduction <add>, %44, %cst_25 [1, 2] : vector<1x8x1xf32> to vector<1xf32>
      %46 = vector.shape_cast %45 : vector<1xf32> to vector<1x1x1xf32>
      %47 = vector.extract %46[0, 0, 0] : f32 from vector<1x1x1xf32>
      %48 = arith.divf %42, %47 : f32
      %c0_26 = arith.constant 0 : index
      %c0_27 = arith.constant 0 : index
      %49 = memref.load %arg4[%c0_26, %c0_27] : memref<1x1xf32, #tpu.memory_space<smem>>
      memref.store %48, %arg4[%c0_26, %c0_27] : memref<1x1xf32, #tpu.memory_space<smem>>
    } else {
    }
    return
  }
  func.func @transform_0(%arg0: i32) -> (i32, i32) {
    %c0_i32 = arith.constant 0 : i32
    %c0_i32_0 = arith.constant 0 : i32
    return %arg0, %c0_i32 : i32, i32
  }
  func.func @transform_1(%arg0: i32) -> (i32, i32) {
    %c0_i32 = arith.constant 0 : i32
    %c0_i32_0 = arith.constant 0 : i32
    return %arg0, %c0_i32 : i32, i32
  }
  func.func @transform_2(%arg0: i32) -> (i32, i32) {
    %c0_i32 = arith.constant 0 : i32
    %c0_i32_0 = arith.constant 0 : i32
    %c0_i32_1 = arith.constant 0 : i32
    return %c0_i32, %c0_i32_0 : i32, i32
  }
  func.func @transform_3(%arg0: i32) -> (i32, i32) {
    %c0_i32 = arith.constant 0 : i32
    %c0_i32_0 = arith.constant 0 : i32
    %c0_i32_1 = arith.constant 0 : i32
    return %c0_i32, %c0_i32_0 : i32, i32
  }
}

</mosaic_0001>

<bundles_post_ra>
// kernel: tpu_custom_call.1
= control target key start
LH: loop header
LB: loop body
LE: loop exit
PB: predicated region body
PF: predicated region fallthrough
CT: control target
= control target key end

     0   :  { %vm25_vm0 = vcmask 130048   ;;  %v154_v2 = vmov 0   ;;  %s199_s0 = inlined_call_operand.vmem [shape: f32[8,16], index: 0, kind: input, shape index: {}]   ;;  %s200_s1 = inlined_call_operand.vmem [shape: s32[8,1], index: 1, kind: input, shape index: {}]   ;;  %s201_s2 = inlined_call_operand.vmem [shape: f32[1,16], index: 2, kind: input, shape index: {}]   ;;  %s202_s3 = inlined_call_operand.hbm [shape: f32[1,1], index: 3, kind: output, shape index: {}]  }
   0x1   :  { %v22_v0 = vld [vmem:[%s199_s0] sm:$0xff]  ;;  %132 = vset.pattern.permute.xlu0 %v154_v2 }
   0x2   :  { %v26_v1 = vsel %vm25_vm0, %v22_v0, -inf }
   0x3   :  { %8 = vsyncpa [#allocation5], 0  ;;  %27 = vmax.xlane.f32.xlu0 %v26_v1  ;;  %v23_v3 = vld [vmem:[%s200_s1] sm:$0xff]  ;;  %v38_v9 = vlaneseq  ;;  %vm19_vm2 = vcmask 7168   ;;  %v155_v17 = vmov 0.0   ;;  %s113_s19 = sshll.u32 %s202_s3, 4  ;;  %s114_s19 = int_to_ptr.hbm [resolvable:$true] %s113_s19 }
   0x4   :  { %v133_v11 = vld [vmem:[%s201_s2] ss:$0 sm:$0xff]  ;;  %21 = vst.msk [vmem:[#allocation3] sm:$0xff] %vm19_vm2, %v155_v17  ;;  %s156_s22 = smov [#allocation4]  }
   0x5   :  { %v39_v10 = vand.u32 127, %v38_v9  ;;  %20 = vst.msk [vmem:[#allocation2] sm:$0xff] %vm19_vm2, %v155_v17 }
   0xb   :  { %v61_v21 = vld [vmem:[#allocation3] sm:$0xff] }
   0xc   :  { %v55_v27 = vld [vmem:[#allocation2] sm:$0xff] }
  0x17   :  { %41 = vperm.xlu0 %132, %v23_v3  }
  0x76   :  { %v28_v4 = vpop.xlane.xlu0 %27 }
  0x77   :  { %v29_v5 = vsub.f32 %v22_v0, %v28_v4 }
  0x79   :  { %v30_v6 = vmul.f32 1.442695, %v29_v5 }
  0x7b   :  { %134 = vpow2.f32 %v30_v6 }
  0x81   :  { %v135_v7 = vpop.eup %134 }
  0x82   :  { %v32_v8 = vsel %vm25_vm0, %v135_v7, 0.0 }
  0x83   :  { %33 = vadd.xlane.f32.xlu1 %v32_v8 }
  0x89   :  { %v42_v12 = vpop.permute.xlu0 %41 }
  0x8a   :  { %vm43_vm1 = vcmp.eq.s32.totalorder %v39_v10, %v42_v12 }
  0x8b   :  { %v47_v13 = vsel %vm43_vm1, %v133_v11, 0.0 }
  0x8c   :  { %v48_v14 = vsel %vm25_vm0, %v47_v13, 0.0  ;;  %v51_v15 = vmul.f32 %v47_v13, %v22_v0 }
  0x8d   :  { %49 = vadd.xlane.f32.xlu1 %v48_v14 }
  0x8e   :  { %v52_v16 = vsel %vm25_vm0, %v51_v15, 0.0 }
  0x8f   :  { %53 = vadd.xlane.f32.xlu2 %v52_v16 }
  0xf6   :  { %v34_v18 = vpop.xlane.xlu1 %33 }
  0xf7   :  { %136 = vlog2.f32 %v34_v18 }
  0xfd   :  { %v137_v19 = vpop.eup %136 }
  0xfe   :  { %v36_v20 = vmul.f32 0.6931472, %v137_v19 }
 0x100   :  { %v37_v22 = vadd.f32 %v36_v20, %v28_v4  ;;  %v50_v23 = vpop.xlane.xlu1 %49 }
 0x101   :  { %v62_v24 = vadd.f32 %v61_v21, %v50_v23 }
 0x102   :  { %v56_v25 = vmul.f32 %v50_v23, %v37_v22  ;;  %v54_v26 = vpop.xlane.xlu2 %53 }
 0x103   :  { %63 = vst.msk [vmem:[#allocation3] sm:$0xff] %vm19_vm2, %v62_v24 }
 0x104   :  { %v57_v28 = vsub.f32 %v56_v25, %v54_v26 }
 0x106   :  { %v58_v29 = vadd.f32 %v57_v28, %v55_v27 }
 0x108   :  { %60 = vst.msk [vmem:[#allocation2] sm:$0xff] %vm19_vm2, %v58_v29 }
 0x10a   :  { %v78_v30 = vld [vmem:[#allocation3] sm:$0xff] }
 0x10b   :  { %v79_v31 = vsel %vm19_vm2, %v78_v30, 0.0 }
 0x10c   :  { %80 = vadd.xlane.f32.xlu1 %v79_v31 }
 0x10f   :  { %v67_v32 = vld [vmem:[#allocation2] sm:$0xff] }
 0x110   :  { %v68_v33 = vsel %vm19_vm2, %v67_v32, 0.0 }
 0x111   :  { %69 = vadd.xlane.f32.xlu2 %v68_v33 }
 0x17f   :  { %v81_v34 = vpop.xlane.xlu1 %80 }
 0x180   :  { %v82_v35 = vrot.slane %v81_v34, 4 }
 0x182   :  { %v83_v36 = vadd.f32 %v82_v35, %v81_v34 }
 0x184   :  { %v84_v37 = vrot.slane %v83_v36, 2  ;;  %v70_v38 = vpop.xlane.xlu2 %69 }
 0x185   :  { %v71_v39 = vrot.slane %v70_v38, 4 }
 0x186   :  { %v85_v41 = vadd.f32 %v84_v37, %v83_v36 }
 0x187   :  { %v72_v40 = vadd.f32 %v71_v39, %v70_v38 }
 0x188   :  { %v86_v44 = vrot.slane %v85_v41, 1 }
 0x189   :  { %v73_v42 = vrot.slane %v72_v40, 2 }
 0x18a   :  { %v87_v47 = vadd.f32 %v86_v44, %v85_v41 }
 0x18b   :  { %v74_v43 = vadd.f32 %v73_v42, %v72_v40 }
 0x18d   :  { %v75_v45 = vrot.slane %v74_v43, 1 }
 0x18f   :  { %v76_v46 = vadd.f32 %v75_v45, %v74_v43 }
 0x191   :  { %123 = vpush %v76_v46 }
 0x192   :  { %125 = vpush %v87_v47 }
 0x1c2   :  { %s124_s1 = spop %123 }
 0x1c3   :  { %s126_s2 = spop %125 }
 0x1c4   :  { %v89_v48 = vstv %s126_s2 }
 0x1c5   :  { %138 = vrcp.f32 %v89_v48  ;;  %v101_v52 = vand.u32 2147483648, %v89_v48  ;;  %v99_v54 = vand.u32 2147483647, %v89_v48  ;;  %vm95_vm4 = vweird.f32 %v89_v48 }
 0x1c7   :  { %v102_v56 = vor.u32 1.1754944e-38, %v101_v52  ;;  %vm100_vm6 = vcmp.eq.f32.partialorder %v99_v54, 8.507059e+37 }
 0x1cb   :  { %v139_v49 = vpop.eup %138 }
 0x1cc   :  { %v91_v50 = vmul.f32 %v139_v49, %v89_v48  ;;  %vm96_vm3 = vweird.f32 %v139_v49 }
 0x1cd   :  { %vm97_vm5 = vmor %vm95_vm4, %vm96_vm3 }
 0x1ce   :  { %v92_v51 = vsub.f32 1.0, %v91_v50 }
 0x1d0   :  { %v93_v53 = vmul.f32 %v139_v49, %v92_v51 }
 0x1d2   :  { %v94_v55 = vadd.f32 %v139_v49, %v93_v53 }
 0x1d4   :  { %v98_v57 = vsel %vm97_vm5, %v139_v49, %v94_v55 }
 0x1d5   :  { %v103_v58 = vsel %vm100_vm6, %v102_v56, %v98_v57 }
 0x1d6   :  { %127 = vpush %v103_v58 }
 0x207   :  { %s128_s20 = spop %127 }
 0x208   :  { %s105_s21 = smul.f32 %s128_s20, %s124_s1 }
 0x20a   :  { %107 = sst [smem:[#allocation4]] %s105_s21 }
 0x20b   :  { %116 = dma.smem_to_hbm %s156_s22, 16, %s114_s19, [#allocation5]  }
 0x20c   :  { %152 = dma.done.wait [#allocation5], 16  }
 0x20d   :  { %153 = vsyncadd [#allocation5], 4294967280 }
 0x20e   :  { %121 = sfence }
 0x20f   :  { %122 = vsyncpa [#allocation5], 1 }

</bundles_post_ra>
